<compile_context>
chip_gen: v6e
topology: v6e:2x2x1
jax: 0.10.0
libtpu: 0.0.40
codegen_flags: <defaults>
</compile_context>

<pallas_src>
import jax
import jax.numpy as jnp
from jax.experimental import pallas as pl
from jax.experimental.pallas import tpu as pltpu


def _round_up(x, m):
    return ((x + m - 1) // m) * m


def actor_kernel(xT_ref, w1_ref, b1_ref, w2_ref, b2_ref, wm_ref, bm_ref,
                 meant_ref):
    """One batch tile in transposed (features, batch) layout.

    xT_ref:    (S, TB)  state tile, lane-dense in TB
    w*_ref:    PyTorch-layout weights (out, in); b*_ref: (out, 1) f32
    meant_ref: (A, TB)  transposed tanh(mean) output (f32), lane-dense in TB
    """
    x = xT_ref[...]                                              # (S, TB)

    # Layer 1: h1^T = tanh(W1 @ x^T + b1) -> (64, TB)
    h1 = jnp.tanh(
        jnp.dot(w1_ref[...], x, preferred_element_type=jnp.float32)
        + b1_ref[...])
    # Layer 2: h2^T = tanh(W2 @ h1^T + b2) -> (32, TB)
    h2 = jnp.tanh(
        jnp.dot(w2_ref[...], h1, preferred_element_type=jnp.float32)
        + b2_ref[...])
    # Mean head: mean^T = tanh(Wm @ h2^T + bm) -> (A, TB)
    mean = jnp.tanh(
        jnp.dot(wm_ref[...], h2, preferred_element_type=jnp.float32)
        + bm_ref[...])

    meant_ref[...] = mean.astype(meant_ref.dtype)


def actor_forward(state, params, *, block_b=8192, min_grid_steps=1,
                  small_batch_fallback=True):
    """Forward pass.  Returns (mean, std), each of shape (B, action_dim).

    min_grid_steps: set to 2 on v7x so both TensorCores get a grid step;
                    keep 1 on v5e/v6e (single TC -> one big tile is best).
    """
    state = jnp.asarray(state, jnp.float32)      # accepts lists (from_list)
    if state.ndim == 1:
        state = state[None, :]
    B, S = state.shape
    A = params["wm"].shape[0]

    # std = exp(log_std).expand_as(mean): batch-independent, done in wrapper.
    std = jnp.broadcast_to(
        jnp.exp(params["log_std"].astype(jnp.float32)).reshape(1, A), (B, A))

    # Tiny batches: pallas_call launch + pad-to-128 overhead dominates; XLA
    # fuses this 3-layer MLP fine, so run it directly.
    if small_batch_fallback and B <= 128:
        h1 = jnp.tanh(state @ params["w1"].T + params["b1"].T)
        h2 = jnp.tanh(h1 @ params["w2"].T + params["b2"].T)
        mean = jnp.tanh(h2 @ params["wm"].T + params["bm"].T)
        return mean, std

    # Padding-aware tile selection: balanced tiles, minimal batch padding.
    grid = max(pl.cdiv(B, block_b), min_grid_steps)
    TB = _round_up(pl.cdiv(B, grid), 128)        # lane width multiple
    Bp = grid * TB

    xT = state.T                                 # (S, B): lane-dense in batch
    if Bp != B:
        xT = jnp.pad(xT, ((0, 0), (0, Bp - B)))

    w1 = params["w1"].astype(jnp.float32)
    w2 = params["w2"].astype(jnp.float32)
    wm = params["wm"].astype(jnp.float32)
    b1 = params["b1"].astype(jnp.float32)
    b2 = params["b2"].astype(jnp.float32)
    bm = params["bm"].astype(jnp.float32)

    weight_bytes = 4 * (64 * S + 64 + 32 * 64 + 32 + A * 32 + A)
    cost = pl.CostEstimate(
        flops=2 * Bp * (S * 64 + 64 * 32 + 32 * A),
        transcendentals=Bp * (64 + 32 + A),
        bytes_accessed=4 * Bp * S + 4 * Bp * A + weight_bytes,
    )

    meant = pl.pallas_call(
        actor_kernel,
        out_shape=jax.ShapeDtypeStruct((A, Bp), jnp.float32),
        grid=(grid,),
        in_specs=[
            pl.BlockSpec((S, TB), lambda i: (0, i)),     # state tile (lane-dense)
            pl.BlockSpec((64, S), lambda i: (0, 0)),     # W1 (VMEM-resident)
            pl.BlockSpec((64, 1), lambda i: (0, 0)),     # b1
            pl.BlockSpec((32, 64), lambda i: (0, 0)),    # W2
            pl.BlockSpec((32, 1), lambda i: (0, 0)),     # b2
            pl.BlockSpec((A, 32), lambda i: (0, 0)),     # Wm
            pl.BlockSpec((A, 1), lambda i: (0, 0)),      # bm
        ],
        out_specs=pl.BlockSpec((A, TB), lambda i: (0, i)),
        compiler_params=pltpu.CompilerParams(
            dimension_semantics=("parallel",)),
        cost_estimate=cost,
    )(xT, w1, b1, w2, b2, wm, bm)

    # Padded columns of meant hold tanh-of-bias garbage; slice them off here.
    mean = meant[:, :B].T                                # (B, A)
    return mean, std


def init_params(key, state_dim, action_dim):
    """nn.Linear-style init (uniform +/- 1/sqrt(fan_in)), PyTorch (out,in) layout."""
    ks = jax.random.split(key, 6)

    def linear(kw, kb, fan_in, fan_out):
        bound = 1.0 / jnp.sqrt(fan_in)
        w = jax.random.uniform(kw, (fan_out, fan_in), jnp.float32, -bound, bound)
        b = jax.random.uniform(kb, (fan_out, 1), jnp.float32, -bound, bound)
        return w, b

    w1, b1 = linear(ks[0], ks[1], state_dim, 64)
    w2, b2 = linear(ks[2], ks[3], 64, 32)
    wm, bm = linear(ks[4], ks[5], 32, action_dim)
    log_std = jnp.zeros((action_dim,), jnp.float32)   # nn.Parameter(torch.zeros(A))
    return {"w1": w1, "b1": b1, "w2": w2, "b2": b2, "wm": wm, "bm": bm,
            "log_std": log_std}


def actor_reference(state, params):
    """Pure-JAX reference for correctness checks."""
    state = jnp.asarray(state, jnp.float32)
    if state.ndim == 1:
        state = state[None, :]
    h1 = jnp.tanh(state @ params["w1"].T + params["b1"].T)
    h2 = jnp.tanh(h1 @ params["w2"].T + params["b2"].T)
    mean = jnp.tanh(h2 @ params["wm"].T + params["bm"].T)
    std = jnp.broadcast_to(jnp.exp(params["log_std"])[None, :], mean.shape)
    return mean, std


if __name__ == "__main__":
    state_dim, action_dim = 8, 4
    key = jax.random.PRNGKey(0)
    k_params, k_s1, k_s2 = jax.random.split(key, 3)
    params = init_params(k_params, state_dim, action_dim)

    # --- small batch (matches PyTorch-style usage); fallback path ---
    batch = 2
    state = jax.random.normal(k_s1, (batch, state_dim), jnp.float32)
    mean, std = actor_forward(state, params)
    jax.block_until_ready((mean, std))
    mean_ref, std_ref = actor_reference(state, params)
    assert mean.shape == (batch, action_dim) and std.shape == (batch, action_dim)
    assert jnp.allclose(mean, mean_ref, atol=1e-5, rtol=1e-5)
    assert jnp.allclose(std, std_ref, atol=1e-5, rtol=1e-5)

    # --- same small batch, forced through the Pallas kernel (pads to 128) ---
    mean_p, std_p = actor_forward(state, params, small_batch_fallback=False)
    jax.block_until_ready((mean_p, std_p))
    assert jnp.allclose(mean_p, mean_ref, atol=1e-5, rtol=1e-5)
    assert jnp.allclose(std_p, std_ref, atol=1e-5, rtol=1e-5)

    # --- 1-D state path (module unsqueezes to batch of 1) ---
    mean1, std1 = actor_forward(state[0], params)
    jax.block_until_ready((mean1, std1))
    assert mean1.shape == (1, action_dim) and std1.shape == (1, action_dim)
    assert jnp.allclose(mean1, mean_ref[:1], atol=1e-5, rtol=1e-5)

    # --- larger batch: Pallas path, padding-aware TB (B=600 -> Bp=640) ---
    big = 600
    state_big = jax.random.normal(k_s2, (big, state_dim), jnp.float32)
    mean_b, std_b = actor_forward(state_big, params)
    jax.block_until_ready((mean_b, std_b))
    mean_br, std_br = actor_reference(state_big, params)
    assert mean_b.shape == (big, action_dim)
    assert jnp.allclose(mean_b, mean_br, atol=1e-5, rtol=1e-5)
    assert jnp.allclose(std_b, std_br, atol=1e-5, rtol=1e-5)

    # --- multi-step grid (v7x-style: 2 parallel steps across TensorCores) ---
    mean_g2, std_g2 = actor_forward(state_big, params, min_grid_steps=2)
    jax.block_until_ready((mean_g2, std_g2))
    assert jnp.allclose(mean_g2, mean_br, atol=1e-5, rtol=1e-5)
    assert jnp.allclose(std_g2, std_br, atol=1e-5, rtol=1e-5)

    print("KERNEL_OK")
</pallas_src>

<mosaic_0001>
module attributes {stable_mosaic.version = 11 : i64} {
  func.func @actor_kernel(%arg0: i32, %arg1: memref<8x128xf32, #tpu.memory_space<vmem>>, %arg2: memref<64x8xf32, #tpu.memory_space<vmem>>, %arg3: memref<64x1xf32, #tpu.memory_space<vmem>>, %arg4: memref<32x64xf32, #tpu.memory_space<vmem>>, %arg5: memref<32x1xf32, #tpu.memory_space<vmem>>, %arg6: memref<4x32xf32, #tpu.memory_space<vmem>>, %arg7: memref<4x1xf32, #tpu.memory_space<vmem>>, %arg8: memref<4x128xf32, #tpu.memory_space<vmem>>) attributes {dimension_semantics = [#tpu.dimension_semantics<parallel>], iteration_bounds = array<i64: 1>, scalar_prefetch = 0 : i64, scratch_operands = 0 : i64, tpu.core_type = #tpu.core_type<tc>, window_params = [{transform_indices = @transform_0, window_bounds = array<i64: 8, 128>}, {pipeline_mode = #tpu.pipeline_mode<synchronous>, transform_indices = @transform_1, window_bounds = array<i64: 64, 8>}, {pipeline_mode = #tpu.pipeline_mode<synchronous>, transform_indices = @transform_2, window_bounds = array<i64: 64, 1>}, {pipeline_mode = #tpu.pipeline_mode<synchronous>, transform_indices = @transform_3, window_bounds = array<i64: 32, 64>}, {pipeline_mode = #tpu.pipeline_mode<synchronous>, transform_indices = @transform_4, window_bounds = array<i64: 32, 1>}, {pipeline_mode = #tpu.pipeline_mode<synchronous>, transform_indices = @transform_5, window_bounds = array<i64: 4, 32>}, {pipeline_mode = #tpu.pipeline_mode<synchronous>, transform_indices = @transform_6, window_bounds = array<i64: 4, 1>}, {transform_indices = @transform_7, window_bounds = array<i64: 4, 128>}]} {
    %c0 = arith.constant 0 : index
    %c0_0 = arith.constant 0 : index
    %0 = vector.load %arg1[%c0, %c0_0] : memref<8x128xf32, #tpu.memory_space<vmem>>, vector<8x128xf32>
    %c0_1 = arith.constant 0 : index
    %c0_2 = arith.constant 0 : index
    %1 = vector.load %arg2[%c0_1, %c0_2] : memref<64x8xf32, #tpu.memory_space<vmem>>, vector<64x8xf32>
    %cst = arith.constant dense<0.000000e+00> : vector<64x128xf32>
    %2 = tpu.matmul %1, %0, %cst {dimension_numbers = #tpu.dot_dimension_numbers<[1], [0], [0], [1], [0, 0, 1, 1], [], []>} : vector<64x8xf32>, vector<8x128xf32>, vector<64x128xf32> -> vector<64x128xf32>
    %c0_3 = arith.constant 0 : index
    %c0_4 = arith.constant 0 : index
    %3 = vector.load %arg3[%c0_3, %c0_4] : memref<64x1xf32, #tpu.memory_space<vmem>>, vector<64x1xf32>
    %4 = vector.broadcast %3 : vector<64x1xf32> to vector<64x128xf32>
    %5 = arith.addf %2, %4 : vector<64x128xf32>
    %6 = math.tanh %5 : vector<64x128xf32>
    %c0_5 = arith.constant 0 : index
    %c0_6 = arith.constant 0 : index
    %7 = vector.load %arg4[%c0_5, %c0_6] : memref<32x64xf32, #tpu.memory_space<vmem>>, vector<32x64xf32>
    %cst_7 = arith.constant dense<0.000000e+00> : vector<32x128xf32>
    %8 = tpu.matmul %7, %6, %cst_7 {dimension_numbers = #tpu.dot_dimension_numbers<[1], [0], [0], [1], [0, 0, 1, 1], [], []>} : vector<32x64xf32>, vector<64x128xf32>, vector<32x128xf32> -> vector<32x128xf32>
    %c0_8 = arith.constant 0 : index
    %c0_9 = arith.constant 0 : index
    %9 = vector.load %arg5[%c0_8, %c0_9] : memref<32x1xf32, #tpu.memory_space<vmem>>, vector<32x1xf32>
    %10 = vector.broadcast %9 : vector<32x1xf32> to vector<32x128xf32>
    %11 = arith.addf %8, %10 : vector<32x128xf32>
    %12 = math.tanh %11 : vector<32x128xf32>
    %c0_10 = arith.constant 0 : index
    %c0_11 = arith.constant 0 : index
    %13 = vector.load %arg6[%c0_10, %c0_11] : memref<4x32xf32, #tpu.memory_space<vmem>>, vector<4x32xf32>
    %cst_12 = arith.constant dense<0.000000e+00> : vector<4x128xf32>
    %14 = tpu.matmul %13, %12, %cst_12 {dimension_numbers = #tpu.dot_dimension_numbers<[1], [0], [0], [1], [0, 0, 1, 1], [], []>} : vector<4x32xf32>, vector<32x128xf32>, vector<4x128xf32> -> vector<4x128xf32>
    %c0_13 = arith.constant 0 : index
    %c0_14 = arith.constant 0 : index
    %15 = vector.load %arg7[%c0_13, %c0_14] : memref<4x1xf32, #tpu.memory_space<vmem>>, vector<4x1xf32>
    %16 = vector.broadcast %15 : vector<4x1xf32> to vector<4x128xf32>
    %17 = arith.addf %14, %16 : vector<4x128xf32>
    %18 = math.tanh %17 : vector<4x128xf32>
    %c0_15 = arith.constant 0 : index
    %c0_16 = arith.constant 0 : index
    %19 = vector.load %arg8[%c0_15, %c0_16] : memref<4x128xf32, #tpu.memory_space<vmem>>, vector<4x128xf32>
    tpu.vector_store %arg8[%c0_15, %c0_16], %18 {strides = array<i32>} : memref<4x128xf32, #tpu.memory_space<vmem>>, vector<4x128xf32>,
    return
  }
  func.func @transform_0(%arg0: i32) -> (i32, i32) {
    %c0_i32 = arith.constant 0 : i32
    %c0_i32_0 = arith.constant 0 : i32
    return %c0_i32, %arg0 : i32, i32
  }
  func.func @transform_1(%arg0: i32) -> (i32, i32) {
    %c0_i32 = arith.constant 0 : i32
    %c0_i32_0 = arith.constant 0 : i32
    %c0_i32_1 = arith.constant 0 : i32
    return %c0_i32, %c0_i32_0 : i32, i32
  }
  func.func @transform_2(%arg0: i32) -> (i32, i32) {
    %c0_i32 = arith.constant 0 : i32
    %c0_i32_0 = arith.constant 0 : i32
    %c0_i32_1 = arith.constant 0 : i32
    return %c0_i32, %c0_i32_0 : i32, i32
  }
  func.func @transform_3(%arg0: i32) -> (i32, i32) {
    %c0_i32 = arith.constant 0 : i32
    %c0_i32_0 = arith.constant 0 : i32
    %c0_i32_1 = arith.constant 0 : i32
    return %c0_i32, %c0_i32_0 : i32, i32
  }
  func.func @transform_4(%arg0: i32) -> (i32, i32) {
    %c0_i32 = arith.constant 0 : i32
    %c0_i32_0 = arith.constant 0 : i32
    %c0_i32_1 = arith.constant 0 : i32
    return %c0_i32, %c0_i32_0 : i32, i32
  }
  func.func @transform_5(%arg0: i32) -> (i32, i32) {
    %c0_i32 = arith.constant 0 : i32
    %c0_i32_0 = arith.constant 0 : i32
    %c0_i32_1 = arith.constant 0 : i32
    return %c0_i32, %c0_i32_0 : i32, i32
  }
  func.func @transform_6(%arg0: i32) -> (i32, i32) {
    %c0_i32 = arith.constant 0 : i32
    %c0_i32_0 = arith.constant 0 : i32
    %c0_i32_1 = arith.constant 0 : i32
    return %c0_i32, %c0_i32_0 : i32, i32
  }
  func.func @transform_7(%arg0: i32) -> (i32, i32) {
    %c0_i32 = arith.constant 0 : i32
    %c0_i32_0 = arith.constant 0 : i32
    return %c0_i32, %arg0 : i32, i32
  }
}

</mosaic_0001>

<bundles_post_ra>
// kernel: tpu_custom_call.1
= control target key start
LH: loop header
LB: loop body
LE: loop exit
PB: predicated region body
PF: predicated region fallthrough
CT: control target
= control target key end

     0   :  { %vm84_vm0 = vcmask 64512   ;;  %v589_v4 = vmov 0   ;;  %s729_s0 = inlined_call_operand.vmem [shape: f32[8,128], index: 0, kind: input, shape index: {}]   ;;  %s730_s1 = inlined_call_operand.vmem [shape: f32[64,8], index: 1, kind: input, shape index: {}]   ;;  %s731_s2 = inlined_call_operand.vmem [shape: f32[64,1], index: 2, kind: input, shape index: {}]   ;;  %s732_s3 = inlined_call_operand.vmem [shape: f32[32,64], index: 3, kind: input, shape index: {}]   ;;  %s733_s4 = inlined_call_operand.vmem [shape: f32[32,1], index: 4, kind: input, shape index: {}]   ;;  %s734_s5 = inlined_call_operand.vmem [shape: f32[4,32], index: 5, kind: input, shape index: {}]   ;;  %s735_s6 = inlined_call_operand.vmem [shape: f32[4,1], index: 6, kind: input, shape index: {}]   ;;  %s736_s7 = inlined_call_operand.hbm [shape: f32[4,128], index: 7, kind: output, shape index: {}]  }
   0x1   :  { %v27_v0 = vld [vmem:[%s729_s0] sm:$0xff]  ;;  %v29_v2 = vld [vmem:[%s730_s1 + $0x8] sm:$0xff]  ;;  %v30_v3 = vld [vmem:[%s730_s1 + $0x10] sm:$0xff]  ;;  %539 = vset.pattern.permute.xlu0 %v589_v4  ;;  %540 = vset.pattern.permute.xlu1 %v589_v4 }
   0x2   :  { %v28_v1 = vld [vmem:[%s730_s1] sm:$0xff]  ;;  %488 = vmatprep.subr.mxu0 %v27_v0  ;;  %v43_v5 = vld [vmem:[%s731_s2 + $0x38] sm:$0xff]  ;;  %v41_v6 = vld [vmem:[%s731_s2 + $0x28] sm:$0xff] }
   0x3   :  { %490 = vmatprep.mubr.msk.f32.mxu0 %vm84_vm0, %v28_v1  ;;  %489 = vmatpush3.msra.mxu0 %v27_v0  ;;  %v31_v7 = vld [vmem:[%s730_s1 + $0x18] sm:$0xff]  ;;  %v32_v8 = vld [vmem:[%s730_s1 + $0x20] sm:$0xff]  ;;  %v42_v9 = vld [vmem:[%s731_s2 + $0x30] sm:$0xff] }
   0x4   :  { %491 = vmatmul.mubr.msk.f32.vlgmr.msra.gmra.mxu0 %vm84_vm0, %v29_v2  ;;  %81 = vperm.xlu0 %539, %v43_v5   ;;  %v40_v10 = vld [vmem:[%s731_s2 + $0x20] sm:$0xff] }
   0x5   :  { %493 = vmatprep.mubr.msk.f32.mxu0 %vm84_vm0, %v30_v3  ;;  %71 = vperm.xlu1 %540, %v41_v6  }
   0x8   :  { %494 = vmatmul.mubr.msk.f32.gmra.mxu0 %vm84_vm0, %v31_v7 }
   0x9   :  { %12 = vsyncpa [#allocation3], 0  ;;  %496 = vmatprep.mubr.msk.f32.mxu0 %vm84_vm0, %v32_v8  ;;  %v33_v11 = vld [vmem:[%s730_s1 + $0x28] sm:$0xff]  ;;  %76 = vperm.xlu0 %539, %v42_v9   ;;  %v34_v12 = vld [vmem:[%s730_s1 + $0x30] sm:$0xff]  ;;  %vm250_vm1 = vcmask 523264   ;;  %v590_v59 = vmov 0.0  }
   0xa   :  { %66 = vperm.xlu1 %540, %v40_v10   ;;  %v39_v13 = vld [vmem:[%s731_s2 + $0x18] sm:$0xff]  ;;  %v38_v14 = vld [vmem:[%s731_s2 + $0x10] sm:$0xff]  ;;  %v37_v16 = vld [vmem:[%s731_s2 + $0x8] sm:$0xff]  ;;  %524 = vmatprep.subr.mxu0 %v590_v59  ;;  %vm591_vm2 = vmmov 0   ;;  %vm359_vm3 = vcmask 261120   ;;  %s592_s25 = smov [#allocation2]  }
   0xb   :  { %v35_v15 = vld [vmem:[%s730_s1 + $0x38] sm:$0xff]  ;;  %v36_v17 = vld [vmem:[%s731_s2] sm:$0xff]  ;;  %v228_v19 = vld [vmem:[%s733_s4 + $0x10] sm:$0xff]  ;;  %s441_s26 = sshll.u32 %s592_s25, 4  ;;  %s442_s26 = int_to_ptr.vmem [resolvable:$true] %s441_s26 }
   0xc   :  { %497 = vmatmul.mubr.msk.f32.gmra.mxu0 %vm84_vm0, %v33_v11  ;;  %v229_v18 = vld [vmem:[%s733_s4 + $0x18] sm:$0xff]  ;;  %v227_v20 = vld [vmem:[%s733_s4 + $0x8] sm:$0xff]  ;;  %v226_v21 = vld [vmem:[%s733_s4] sm:$0xff]  ;;  %s567_s27 = scalar_lea.vmem %s442_s26, 64  ;;  %p572_p1 = scmp.lt.s32.totalorder %s442_s26, %s442_s26 }
   0xd   :  { %499 = vmatprep.mubr.msk.f32.mxu0 %vm84_vm0, %v34_v12  ;;  %61 = vperm.xlu0 %539, %v39_v13   ;;  %v353_v22 = vld [vmem:[%s735_s6] sm:$0xf]  ;;  %v223_v56 = vld [vmem:[%s732_s3 + $0x8] sm:$0xff]  ;;  %v224_v57 = vld [vmem:[%s732_s3 + $0x10] sm:$0xff]  ;;  %p568_p0 = scmp.ne.s32.totalorder %s442_s26, %s567_s27  ;;  %p573_p2 = scmp.lt.s32.totalorder %s567_s27, %s567_s27 }
   0xe   :  { %56 = vperm.xlu1 %540, %v38_v14   ;;  %v222_v23 = vld [vmem:[%s732_s3] sm:$0xff]  ;;  %v225_v58 = vld [vmem:[%s732_s3 + $0x18] sm:$0xff] }
   0xf   :  { %518 = vmatprep.mubr.msk.f32.mxu1 %vm250_vm1, %v222_v23  ;;  %v352_v11 = vld [vmem:[%s734_s5] sm:$0xf]  ;;  %p574_p3 = por %p573_p2, %p572_p1 }
  0x10   :  { %500 = vmatmul.mubr.msk.f32.gmra.mxu0 %vm84_vm0, %v35_v15 }
  0x11   :  { %51 = vperm.xlu0 %539, %v37_v16   ;;  %532 = vmatprep.mubr.msk.f32.mxu0 %vm591_vm2, %v590_v59  ;;  %p575_p4 = pnand %p574_p3, %p568_p0 }
  0x12   :  { %46 = vperm.xlu1 %540, %v36_v17  }
  0x15   :  { %247 = vperm.xlu0 %539, %v229_v18  }
  0x16   :  { %242 = vperm.xlu1 %540, %v228_v19  }
  0x19   :  { %237 = vperm.xlu0 %539, %v227_v20  }
  0x1a   :  { %232 = vperm.xlu1 %540, %v226_v21  }
  0x1d   :  { %356 = vperm.xlu0 %539, %v353_v22  }
  0x7f   :  { %v82_v26 = vpop.permute.xlu0 %81 }
  0x80   :  { %v72_v27 = vpop.permute.xlu1 %71 }
  0x84   :  { %v77_v31 = vpop.permute.xlu0 %76 }
  0x85   :  { %v67_v32 = vpop.permute.xlu1 %66 }
  0x88   :  { %v62_v39 = vpop.permute.xlu0 %61 }
  0x89   :  { %v57_v40 = vpop.permute.xlu1 %56 }
  0x8c   :  { %v52_v44 = vpop.permute.xlu0 %51 }
  0x8d   :  { %v47_v45 = vpop.permute.xlu1 %46 }
  0x90   :  { %v248_v60 = vpop.permute.xlu0 %247 }
  0x91   :  { %v243_v62 = vpop.permute.xlu1 %242 }
  0x94   :  { %v238_v2 = vpop.permute.xlu0 %237 }
  0x95   :  { %v233_v6 = vpop.permute.xlu1 %232 }
  0x98   :  { %v357_v13 = vpop.permute.xlu0 %356 }
  0xc4   :  { %v492_v24 = vpop.f32.mrf.mxu0 }
  0xc5   :  { %v181_v46 = vadd.f32 %v492_v24, %v52_v44 }
  0xc6   :  { %v175_v25 = vpop.f32.mrf.mxu0 }
  0xc7   :  { %v176_v47 = vadd.f32 %v175_v25, %v47_v45 }
  0xc8   :  { %v495_v28 = vpop.f32.mrf.mxu0 }
  0xc9   :  { %v191_v42 = vadd.f32 %v495_v28, %v62_v39 }
  0xca   :  { %v185_v29 = vpop.f32.mrf.mxu0 }
  0xcb   :  { %v186_v43 = vadd.f32 %v185_v29, %v57_v40 }
  0xcc   :  { %v498_v30 = vpop.f32.mrf.mxu0 }
  0xcd   :  { %v201_v37 = vadd.f32 %v498_v30, %v72_v27 }
  0xce   :  { %v195_v33 = vpop.f32.mrf.mxu0 }
  0xcf   :  { %v196_v41 = vadd.f32 %v195_v33, %v67_v32 }
  0xd0   :  { %v501_v34 = vpop.f32.mrf.mxu0 }
  0xd1   :  { %v211_v35 = vadd.f32 %v501_v34, %v82_v26 }
  0xd2   :  { %v205_v36 = vpop.f32.mrf.mxu0 }
  0xd3   :  { %541 = vtanh.f32 %v211_v35  ;;  %v206_v38 = vadd.f32 %v205_v36, %v77_v31 }
  0xd5   :  { %543 = vtanh.f32 %v206_v38 }
  0xd6   :  { %545 = vtanh.f32 %v201_v37 }
  0xd7   :  { %547 = vtanh.f32 %v196_v41 }
  0xd8   :  { %549 = vtanh.f32 %v191_v42 }
  0xd9   :  { %551 = vtanh.f32 %v186_v43 }
  0xda   :  { %553 = vtanh.f32 %v181_v46 }
  0xdb   :  { %555 = vtanh.f32 %v176_v47 }
  0xe0   :  { %v542_v48 = vpop.eup %541 }
  0xe1   :  { %502 = vmatprep.subr.mxu1 %v542_v48 }
  0xe2   :  { %v544_v49 = vpop.eup %543  ;;  %503 = vmatpush3.msra.mxu1 %v542_v48 }
  0xe3   :  { %504 = vmatprep.subr.mxu1 %v544_v49  ;;  %v546_v50 = vpop.eup %545 }
  0xe4   :  { %505 = vmatpush3.msra.mxu1 %v544_v49  ;;  %v548_v51 = vpop.eup %547 }
  0xe5   :  { %506 = vmatprep.subr.mxu1 %v546_v50  ;;  %v550_v52 = vpop.eup %549 }
  0xe6   :  { %507 = vmatpush3.msra.mxu1 %v546_v50  ;;  %v552_v53 = vpop.eup %551 }
  0xe7   :  { %508 = vmatprep.subr.mxu1 %v548_v51  ;;  %v554_v54 = vpop.eup %553 }
  0xe8   :  { %509 = vmatpush3.msra.mxu1 %v548_v51  ;;  %v556_v55 = vpop.eup %555 }
  0xe9   :  { %510 = vmatprep.subr.mxu1 %v550_v52 }
  0xea   :  { %511 = vmatpush3.msra.mxu1 %v550_v52 }
  0xeb   :  { %512 = vmatprep.subr.mxu1 %v552_v53 }
  0xec   :  { %513 = vmatpush3.msra.mxu1 %v552_v53 }
  0xed   :  { %514 = vmatprep.subr.mxu1 %v554_v54 }
  0xee   :  { %515 = vmatpush3.msra.mxu1 %v554_v54 }
  0xef   :  { %516 = vmatprep.subr.mxu1 %v556_v55 }
  0xf0   :  { %517 = vmatpush3.msra.mxu1 %v556_v55 }
  0xf1   :  { %519 = vmatmul.mubr.msk.f32.vlgmr.msra.gmra.mxu1 %vm250_vm1, %v223_v56 }
  0xf2   :  { %521 = vmatprep.mubr.msk.f32.mxu1 %vm250_vm1, %v224_v57 }
  0xf5   :  { %522 = vmatmul.mubr.msk.f32.gmra.mxu1 %vm250_vm1, %v225_v58 }
 0x1b1   :  { %v520_v61 = vpop.f32.mrf.mxu1 }
 0x1b2   :  { %v335_v4 = vadd.f32 %v520_v61, %v238_v2 }
 0x1b3   :  { %v329_v63 = vpop.f32.mrf.mxu1 }
 0x1b4   :  { %v330_v7 = vadd.f32 %v329_v63, %v233_v6 }
 0x1b5   :  { %v523_v0 = vpop.f32.mrf.mxu1 }
 0x1b6   :  { %v345_v1 = vadd.f32 %v523_v0, %v248_v60 }
 0x1b7   :  { %v339_v3 = vpop.f32.mrf.mxu1 }
 0x1b8   :  { %557 = vtanh.f32 %v345_v1  ;;  %v340_v5 = vadd.f32 %v339_v3, %v243_v62 }
 0x1ba   :  { %559 = vtanh.f32 %v340_v5 }
 0x1bb   :  { %561 = vtanh.f32 %v335_v4 }
 0x1bc   :  { %563 = vtanh.f32 %v330_v7 }
 0x1c5   :  { %v558_v8 = vpop.eup %557 }
 0x1c6   :  { %525 = vmatpush3.msra.mxu0 %v558_v8 }
 0x1c7   :  { %v560_v9 = vpop.eup %559  ;;  %526 = vmatprep.subr.mxu0 %v590_v59 }
 0x1c8   :  { %527 = vmatpush3.msra.mxu0 %v560_v9  ;;  %v562_v10 = vpop.eup %561 }
 0x1c9   :  { %528 = vmatprep.subr.mxu0 %v590_v59  ;;  %v564_v12 = vpop.eup %563 }
 0x1ca   :  { %529 = vmatpush3.msra.mxu0 %v562_v10 }
 0x1cb   :  { %530 = vmatprep.subr.mxu0 %v590_v59 }
 0x1cc   :  { %531 = vmatpush3.msra.mxu0 %v564_v12 }
 0x1cd   :  { %533 = vmatmul.mubr.msk.f32.vlgmr.msra.gmra.mxu0 %vm359_vm3, %v352_v11 }
 0x28d   :  { %v429_v14 = vpop.f32.mrf.mxu0 }
 0x28e   :  { %v430_v15 = vadd.f32 %v429_v14, %v357_v13 }
 0x28f   :  { %v534_v16 = vpop.f32.mrf.mxu0 }
 0x290   :  { %565 = vtanh.f32 %v430_v15 }
 0x29d   :  { %v566_v17 = vpop.eup %565 }
 0x29e   :  { %434 = vst [vmem:[#allocation2] sm:$0xf] %v566_v17 }
 0x29f   :  { %578 = shalt.err (!%p575_p4)
}
 0x2a0   :  { %444 = dma.vmem_to_hbm [thread:$0]  %s442_s26, 64, %s736_s7, [#allocation3]  }
 0x2a1   :  { %587 = dma.done.wait [#allocation3], 64  }
 0x2a2   :  { %588 = vsyncadd [#allocation3], 4294967232 }
 0x2a3   :  { %448 = vsyncpa [#allocation3], 1 }

</bundles_post_ra>
